<compile_context>
chip_gen: v7x
topology: tpu7x:2x2x1
jax: 0.10.0
libtpu: 0.0.40
codegen_flags: <defaults>
</compile_context>

<pallas_src>
import math

import jax
import jax.numpy as jnp
from jax import lax
from jax.experimental import pallas as pl
from jax.experimental.pallas import tpu as pltpu

_LANE = 128
_HOFF = 8   # sublane-aligned scratch row where the hidden activation is stored


def _band_conv3x3(w, W):
    """HWIO (3,3,Ci,Co) -> (3, W*Ci, W*Co) banded per-ky matmul weights.

    M[ky, xw*Ci+ci, x*Co+co] = w[ky, xw-x+1, ci, co] when |xw-x| <= 1, else 0.
    Out-of-range taps at the W edges are absent from the band, which is exactly
    SAME (zero) padding along W.
    """
    kh, kw, Ci, Co = w.shape
    xw = jnp.arange(W)[:, None]
    x = jnp.arange(W)[None, :]
    d = xw - x + 1                                    # kx tap index
    valid = (d >= 0) & (d < kw)
    dcl = jnp.clip(d, 0, kw - 1)
    wg = w[:, dcl, :, :]                              # (kh, W, W, Ci, Co)
    wg = jnp.where(valid[None, :, :, None, None], wg, 0.0)
    return jnp.transpose(wg, (0, 1, 3, 2, 4)).reshape(kh, W * Ci, W * Co)


def _blockdiag_1x1(a, W):
    """(Ci, Co) per-pixel weight -> (W*Ci, W*Co) block-diagonal matmul weight."""
    eye = jnp.eye(W, dtype=a.dtype)
    Ci, Co = a.shape
    return jnp.einsum('pq,cd->pcqd', eye, a).reshape(W * Ci, W * Co)


@jax.jit
def lblock_forward(x_nchw, w1, b1, w2, b2, w3, b3):
    """x_nchw: (B, Cin, H, W) f32 -> (B, Cout, H, W) f32."""
    B, Cin, H, W = x_nchw.shape
    Cout = w2.shape[-1]

    # Pad Cin -> Cp so that W*Cp is a multiple of 128 (full lane density).
    step = _LANE // math.gcd(W, _LANE)
    Cp = step * ((Cin + step - 1) // step)
    WCp, WCo = W * Cp, W * Cout
    K1 = 3 * WCp

    Hp = H + 2                      # per-image H-padded rows
    Mp = B * Hp                     # padded frame (zero halo rows between images)
    Mrows = Mp - 2                  # rows actually computed (centres p = 1..Mp-2)
    Mc = ((Mrows + 7) // 8) * 8     # pad M to a sublane multiple (unmasked stores)
    hs_rows = ((_HOFF + 1 + Mc + 7) // 8) * 8

    # ---- activations: NHWC, channel-pad, flatten (W,Cp) onto lanes, H-pad ----
    x_nhwc = jnp.transpose(x_nchw, (0, 2, 3, 1))
    x_nhwc = jnp.pad(x_nhwc, ((0, 0), (0, 0), (0, 0), (0, Cp - Cin)))
    x_rows = x_nhwc.reshape(B, H, WCp)
    xpad = jnp.pad(x_rows, ((0, 0), (1, 1), (0, 0))).reshape(Mp, WCp)
    rpad = jnp.maximum(xpad, 0.0)

    # K-stacked activation slab: row i <-> padded row p = i+1; lane chunks are
    # [relu(x)[p-1], relu(x)[p], relu(x)[p+1], x[p]] (3 conv1 taps + path2 row).
    xs = jnp.concatenate(
        [rpad[0:Mrows], rpad[1:Mrows + 1], rpad[2:Mrows + 2],
         xpad[1:Mrows + 1]], axis=1)
    xs = jnp.pad(xs, ((0, Mc - Mrows), (0, 0)))                  # (Mc, 4*WCp)

    # ---- weights, fused along K ----
    w1p = jnp.pad(w1, ((0, 0), (0, 0), (0, Cp - Cin), (0, Cp - Cin)))
    w2p = jnp.pad(w2, ((0, 0), (0, 0), (0, Cp - Cin), (0, 0)))
    mw1 = _band_conv3x3(w1p, W).reshape(K1, WCp)                 # (3*WCp, WCp)
    a_aug = jnp.zeros((Cp, Cout), w3.dtype)
    a_aug = a_aug.at[:Cin, :Cin].set(jnp.eye(Cin, dtype=w3.dtype))
    a_aug = a_aug.at[:Cin, Cin:].set(w3)                         # [I | w3] padded
    mw2 = jnp.concatenate(
        [_band_conv3x3(w2p, W).reshape(K1, WCo),
         _blockdiag_1x1(a_aug, W)], axis=0)                      # (4*WCp, WCo)

    # ---- biases: b1 (channel-padded) and merged b2+b3, tiled over W ----
    b1row = jnp.tile(jnp.pad(b1, ((0, 0), (0, Cp - Cin))), (1, W))    # (1, WCp)
    b23row = jnp.tile(b2 + jnp.pad(b3, ((0, 0), (Cin, 0))), (1, W))   # (1, WCo)

    # Scratch rows that must be zero: per-image top/bottom H-halos of the hidden
    # activation (two of them overwrite the cross-image garbage rows of h).
    halo_rows = []
    for b in range(B):
        halo_rows += [b * Hp + (_HOFF - 1), b * Hp + H + 1 + (_HOFF - 1)]

    def kernel(xs_ref, mw1_ref, b1_ref, mw2_ref, b23_ref, o_ref, hs_ref):
        xs_v = xs_ref[...]                                       # (Mc, 4*WCp)

        # conv1 (Cin->Cin, SAME): single fused K=3*WCp matmul + bias + ReLU.
        h = jnp.maximum(
            jnp.dot(xs_v[:, :K1], mw1_ref[...],
                    preferred_element_type=jnp.float32) + b1_ref[...], 0.0)

        # Hidden activation into the H-padded scratch at a sublane-aligned row
        # (unmasked big store), then zero the per-image halo rows.
        hs_ref[_HOFF:_HOFF + Mc, :] = h
        zrow = jnp.zeros((1, WCp), jnp.float32)
        for r in halo_rows:
            hs_ref[r:r + 1, :] = zrow

        # conv2 (Cin->Cout, SAME) + path2 (identity-augmented 1x1 / concat):
        # single fused K=4*WCp matmul; the +/-1 row shifts are done exactly once.
        s2 = jnp.concatenate(
            [hs_ref[_HOFF - 1:_HOFF - 1 + Mc, :],
             hs_ref[_HOFF:_HOFF + Mc, :],
             hs_ref[_HOFF + 1:_HOFF + 1 + Mc, :],
             xs_v[:, K1:]], axis=1)                              # (Mc, 4*WCp)
        out = jnp.dot(s2, mw2_ref[...],
                      preferred_element_type=jnp.float32) + b23_ref[...]
        o_ref[...] = out.astype(o_ref.dtype)

    out_pad = pl.pallas_call(
        kernel,
        out_shape=jax.ShapeDtypeStruct((Mc, WCo), jnp.float32),
        grid_spec=pltpu.PrefetchScalarGridSpec(
            num_scalar_prefetch=0,
            grid=(1,),                          # whole batch in one fused step
            in_specs=[
                pl.BlockSpec((Mc, 4 * WCp), lambda i: (0, 0)),
                pl.BlockSpec((K1, WCp), lambda i: (0, 0)),
                pl.BlockSpec((1, WCp), lambda i: (0, 0)),
                pl.BlockSpec((4 * WCp, WCo), lambda i: (0, 0)),
                pl.BlockSpec((1, WCo), lambda i: (0, 0)),
            ],
            out_specs=pl.BlockSpec((Mc, WCo), lambda i: (0, 0)),
            scratch_shapes=[pltpu.VMEM((hs_rows, WCp), jnp.float32)],
        ),
        compiler_params=pltpu.CompilerParams(
            dimension_semantics=("arbitrary",),
            vmem_limit_bytes=32 * 1024 * 1024,
        ),
    )(xs, mw1, b1row, mw2, b23row)

    # Valid rows: image b occupies out_pad[b*Hp : b*Hp + H].
    out = jnp.stack([out_pad[b * Hp:b * Hp + H] for b in range(B)], axis=0)
    out = out.reshape(B, H, W, Cout)
    return jnp.transpose(out, (0, 3, 1, 2))                      # -> NCHW


def lblock_reference(x_nchw, w1, b1, w2, b2, w3, b3):
    """Pure-JAX reference (same math as the PyTorch module)."""
    x = jnp.transpose(x_nchw, (0, 2, 3, 1))
    dn = ('NHWC', 'HWIO', 'NHWC')
    h = jax.nn.relu(x)
    h = lax.conv_general_dilated(h, w1, (1, 1), 'SAME',
                                 dimension_numbers=dn) + b1[0]
    h = jax.nn.relu(h)
    out1 = lax.conv_general_dilated(h, w2, (1, 1), 'SAME',
                                    dimension_numbers=dn) + b2[0]
    out2 = jnp.einsum('bhwc,cd->bhwd', x, w3) + b3[0]
    out2 = jnp.concatenate([x, out2], axis=-1)
    return jnp.transpose(out1 + out2, (0, 3, 1, 2))


if __name__ == "__main__":
    # Small shapes consistent with the module: B=2, in_chan=4, out_chan=8, 16x16.
    B, Cin, Cout, H, W = 2, 4, 8, 16, 16

    key = jax.random.PRNGKey(0)
    k_x, k_w1, k_b1, k_w2, k_b2, k_w3, k_b3 = jax.random.split(key, 7)

    x = jax.random.normal(k_x, (B, Cin, H, W), jnp.float32)

    # Deterministic synthetic parameters (HWIO conv weights, row biases).
    w1 = jax.random.normal(k_w1, (3, 3, Cin, Cin), jnp.float32) * 0.1
    b1 = jax.random.normal(k_b1, (1, Cin), jnp.float32) * 0.1
    w2 = jax.random.normal(k_w2, (3, 3, Cin, Cout), jnp.float32) * 0.1
    b2 = jax.random.normal(k_b2, (1, Cout), jnp.float32) * 0.1
    w3 = jax.random.normal(k_w3, (Cin, Cout - Cin), jnp.float32) * 0.1
    b3 = jax.random.normal(k_b3, (1, Cout - Cin), jnp.float32) * 0.1

    out = lblock_forward(x, w1, b1, w2, b2, w3, b3)
    out = jax.block_until_ready(out)

    ref = lblock_reference(x, w1, b1, w2, b2, w3, b3)
    assert out.shape == (B, Cout, H, W), out.shape
    assert jnp.allclose(out, ref, atol=1e-4, rtol=1e-4), \
        float(jnp.max(jnp.abs(out - ref)))

    print("KERNEL_OK")
</pallas_src>

<mosaic_0001>
module attributes {stable_mosaic.version = 11 : i64} {
  func.func @kernel(%arg0: i32, %arg1: memref<40x512xf32, #tpu.memory_space<vmem>>, %arg2: memref<384x128xf32, #tpu.memory_space<vmem>>, %arg3: memref<1x128xf32, #tpu.memory_space<vmem>>, %arg4: memref<512x128xf32, #tpu.memory_space<vmem>>, %arg5: memref<1x128xf32, #tpu.memory_space<vmem>>, %arg6: memref<40x128xf32, #tpu.memory_space<vmem>>, %arg7: memref<56x128xf32, #tpu.memory_space<vmem>>) attributes {dimension_semantics = [#tpu.dimension_semantics<arbitrary>], iteration_bounds = array<i64: 1>, scalar_prefetch = 0 : i64, scratch_operands = 1 : i64, tpu.core_type = #tpu.core_type<tc>, window_params = [{pipeline_mode = #tpu.pipeline_mode<synchronous>, transform_indices = @transform_0, window_bounds = array<i64: 40, 512>}, {pipeline_mode = #tpu.pipeline_mode<synchronous>, transform_indices = @transform_1, window_bounds = array<i64: 384, 128>}, {pipeline_mode = #tpu.pipeline_mode<synchronous>, transform_indices = @transform_2, window_bounds = array<i64: 1, 128>}, {pipeline_mode = #tpu.pipeline_mode<synchronous>, transform_indices = @transform_3, window_bounds = array<i64: 512, 128>}, {pipeline_mode = #tpu.pipeline_mode<synchronous>, transform_indices = @transform_4, window_bounds = array<i64: 1, 128>}, {pipeline_mode = #tpu.pipeline_mode<synchronous>, transform_indices = @transform_5, window_bounds = array<i64: 40, 128>}]} {
    %c0 = arith.constant 0 : index
    %c0_0 = arith.constant 0 : index
    %0 = vector.load %arg1[%c0, %c0_0] : memref<40x512xf32, #tpu.memory_space<vmem>>, vector<40x512xf32>
    %1 = vector.extract_strided_slice %0 {offsets = [0, 0], sizes = [40, 384], strides = [1, 1]} : vector<40x512xf32> to vector<40x384xf32>
    %c0_1 = arith.constant 0 : index
    %c0_2 = arith.constant 0 : index
    %2 = vector.load %arg2[%c0_1, %c0_2] : memref<384x128xf32, #tpu.memory_space<vmem>>, vector<384x128xf32>
    %cst = arith.constant dense<0.000000e+00> : vector<40x128xf32>
    %3 = tpu.matmul %1, %2, %cst {dimension_numbers = #tpu.dot_dimension_numbers<[1], [0], [0], [1], [0, 0, 1, 1], [], []>} : vector<40x384xf32>, vector<384x128xf32>, vector<40x128xf32> -> vector<40x128xf32>
    %c0_3 = arith.constant 0 : index
    %c0_4 = arith.constant 0 : index
    %4 = vector.load %arg3[%c0_3, %c0_4] : memref<1x128xf32, #tpu.memory_space<vmem>>, vector<1x128xf32>
    %5 = vector.broadcast %4 : vector<1x128xf32> to vector<40x128xf32>
    %6 = arith.addf %3, %5 : vector<40x128xf32>
    %cst_5 = arith.constant 0.000000e+00 : f32
    %7 = vector.broadcast %cst_5 : f32 to vector<40x128xf32>
    %8 = arith.maximumf %6, %7 : vector<40x128xf32>
    %c8 = arith.constant 8 : index
    %c0_6 = arith.constant 0 : index
    %9 = vector.load %arg7[%c8, %c0_6] : memref<56x128xf32, #tpu.memory_space<vmem>>, vector<40x128xf32>
    tpu.vector_store %arg7[%c8, %c0_6], %8 {strides = array<i32>} : memref<56x128xf32, #tpu.memory_space<vmem>>, vector<40x128xf32>,
    %cst_7 = arith.constant 0.000000e+00 : f32
    %10 = vector.broadcast %cst_7 : f32 to vector<1x128xf32>
    %c7 = arith.constant 7 : index
    %c0_8 = arith.constant 0 : index
    %11 = vector.load %arg7[%c7, %c0_8] : memref<56x128xf32, #tpu.memory_space<vmem>>, vector<1x128xf32>
    tpu.vector_store %arg7[%c7, %c0_8], %10 {strides = array<i32>} : memref<56x128xf32, #tpu.memory_space<vmem>>, vector<1x128xf32>,
    %c24 = arith.constant 24 : index
    %c0_9 = arith.constant 0 : index
    %12 = vector.load %arg7[%c24, %c0_9] : memref<56x128xf32, #tpu.memory_space<vmem>>, vector<1x128xf32>
    tpu.vector_store %arg7[%c24, %c0_9], %10 {strides = array<i32>} : memref<56x128xf32, #tpu.memory_space<vmem>>, vector<1x128xf32>,
    %c25 = arith.constant 25 : index
    %c0_10 = arith.constant 0 : index
    %13 = vector.load %arg7[%c25, %c0_10] : memref<56x128xf32, #tpu.memory_space<vmem>>, vector<1x128xf32>
    tpu.vector_store %arg7[%c25, %c0_10], %10 {strides = array<i32>} : memref<56x128xf32, #tpu.memory_space<vmem>>, vector<1x128xf32>,
    %c42 = arith.constant 42 : index
    %c0_11 = arith.constant 0 : index
    %14 = vector.load %arg7[%c42, %c0_11] : memref<56x128xf32, #tpu.memory_space<vmem>>, vector<1x128xf32>
    tpu.vector_store %arg7[%c42, %c0_11], %10 {strides = array<i32>} : memref<56x128xf32, #tpu.memory_space<vmem>>, vector<1x128xf32>,
    %c7_12 = arith.constant 7 : index
    %c0_13 = arith.constant 0 : index
    %15 = vector.load %arg7[%c7_12, %c0_13] : memref<56x128xf32, #tpu.memory_space<vmem>>, vector<40x128xf32>
    %c8_14 = arith.constant 8 : index
    %c0_15 = arith.constant 0 : index
    %16 = vector.load %arg7[%c8_14, %c0_15] : memref<56x128xf32, #tpu.memory_space<vmem>>, vector<40x128xf32>
    %c9 = arith.constant 9 : index
    %c0_16 = arith.constant 0 : index
    %17 = vector.load %arg7[%c9, %c0_16] : memref<56x128xf32, #tpu.memory_space<vmem>>, vector<40x128xf32>
    %18 = vector.extract_strided_slice %0 {offsets = [0, 384], sizes = [40, 128], strides = [1, 1]} : vector<40x512xf32> to vector<40x128xf32>
    %19 = tpu.concatenate %15, %16, %17, %18 in 1 : vector<40x128xf32>, vector<40x128xf32>, vector<40x128xf32>, vector<40x128xf32> -> vector<40x512xf32>
    %c0_17 = arith.constant 0 : index
    %c0_18 = arith.constant 0 : index
    %20 = vector.load %arg4[%c0_17, %c0_18] : memref<512x128xf32, #tpu.memory_space<vmem>>, vector<512x128xf32>
    %cst_19 = arith.constant dense<0.000000e+00> : vector<40x128xf32>
    %21 = tpu.matmul %19, %20, %cst_19 {dimension_numbers = #tpu.dot_dimension_numbers<[1], [0], [0], [1], [0, 0, 1, 1], [], []>} : vector<40x512xf32>, vector<512x128xf32>, vector<40x128xf32> -> vector<40x128xf32>
    %c0_20 = arith.constant 0 : index
    %c0_21 = arith.constant 0 : index
    %22 = vector.load %arg5[%c0_20, %c0_21] : memref<1x128xf32, #tpu.memory_space<vmem>>, vector<1x128xf32>
    %23 = vector.broadcast %22 : vector<1x128xf32> to vector<40x128xf32>
    %24 = arith.addf %21, %23 : vector<40x128xf32>
    %c0_22 = arith.constant 0 : index
    %c0_23 = arith.constant 0 : index
    %25 = vector.load %arg6[%c0_22, %c0_23] : memref<40x128xf32, #tpu.memory_space<vmem>>, vector<40x128xf32>
    tpu.vector_store %arg6[%c0_22, %c0_23], %24 {strides = array<i32>} : memref<40x128xf32, #tpu.memory_space<vmem>>, vector<40x128xf32>,
    return
  }
  func.func @transform_0(%arg0: i32) -> (i32, i32) {
    %c0_i32 = arith.constant 0 : i32
    %c0_i32_0 = arith.constant 0 : i32
    %c0_i32_1 = arith.constant 0 : i32
    return %c0_i32, %c0_i32_0 : i32, i32
  }
  func.func @transform_1(%arg0: i32) -> (i32, i32) {
    %c0_i32 = arith.constant 0 : i32
    %c0_i32_0 = arith.constant 0 : i32
    %c0_i32_1 = arith.constant 0 : i32
    return %c0_i32, %c0_i32_0 : i32, i32
  }
  func.func @transform_2(%arg0: i32) -> (i32, i32) {
    %c0_i32 = arith.constant 0 : i32
    %c0_i32_0 = arith.constant 0 : i32
    %c0_i32_1 = arith.constant 0 : i32
    return %c0_i32, %c0_i32_0 : i32, i32
  }
  func.func @transform_3(%arg0: i32) -> (i32, i32) {
    %c0_i32 = arith.constant 0 : i32
    %c0_i32_0 = arith.constant 0 : i32
    %c0_i32_1 = arith.constant 0 : i32
    return %c0_i32, %c0_i32_0 : i32, i32
  }
  func.func @transform_4(%arg0: i32) -> (i32, i32) {
    %c0_i32 = arith.constant 0 : i32
    %c0_i32_0 = arith.constant 0 : i32
    %c0_i32_1 = arith.constant 0 : i32
    return %c0_i32, %c0_i32_0 : i32, i32
  }
  func.func @transform_5(%arg0: i32) -> (i32, i32) {
    %c0_i32 = arith.constant 0 : i32
    %c0_i32_0 = arith.constant 0 : i32
    %c0_i32_1 = arith.constant 0 : i32
    return %c0_i32, %c0_i32_0 : i32, i32
  }
}

</mosaic_0001>

<bundles_post_ra>
// kernel: lblock_forward.1
= control target key start
LH: loop header
LB: loop body
LE: loop exit
PB: predicated region body
PF: predicated region fallthrough
CT: control target
= control target key end

     0   :  { %v898_v3 = vmov 0.0|0.0   ;;  %vm899_vm0 = vmmov 0   ;;  %v900_v4 = vmov 0.0   ;;  %s1370_s1 = inlined_call_operand.vmem [shape: f32[384,128], index: 1, kind: input, shape index: {}]   ;;  %s1371_s0 = inlined_call_operand.vmem [shape: f32[40,512], index: 0, kind: input, shape index: {}]   ;;  %s1372_s3 = inlined_call_operand.vmem [shape: f32[512,128], index: 3, kind: input, shape index: {}]   ;;  %s1373_s2 = inlined_call_operand.vmem [shape: f32[1,128], index: 2, kind: input, shape index: {}]   ;;  %s1374_s4 = inlined_call_operand.vmem [shape: f32[1,128], index: 4, kind: input, shape index: {}]   ;;  %s1375_s5 = inlined_call_operand.vmem [shape: f32[40,128], index: 5, kind: output, shape index: {}]  }
   0x1   :  { %v56_v0 = vld [vmem:[%s1370_s1 + $0x80] sm:$0xff]  ;;  %v57_v1 = vld [vmem:[%s1370_s1 + $0x88] sm:$0xff]  ;;  %807 = vmatprep.subr.bf16.mxu1 %v898_v3  ;;  %760 = vmatprep.mubr.msk.f32.mxu1 %vm899_vm0, %v900_v4  ;;  %285 = vst [vmem:[#allocation2 + $0x7] sm:$0x1] %v900_v4  ;;  %v58_v7 = vld [vmem:[%s1370_s1 + $0x90] sm:$0xff] }
   0x2   :  { %v40_v2 = vld [vmem:[%s1370_s1] sm:$0xff]  ;;  %v775_v5 = vpack.c.bf16 %v57_v1, %v56_v0  ;;  %v41_v6 = vld [vmem:[%s1370_s1 + $0x8] sm:$0xff]  ;;  %v59_v8 = vld [vmem:[%s1370_s1 + $0x98] sm:$0xff] }
   0x3   :  { %v777_v9 = vpack.c.bf16 %v41_v6, %v40_v2  ;;  %v779_v10 = vpack.c.bf16 %v59_v8, %v58_v7  ;;  %v42_v11 = vld [vmem:[%s1370_s1 + $0x10] sm:$0xff]  ;;  %v43_v12 = vld [vmem:[%s1370_s1 + $0x18] sm:$0xff]  ;;  %v72_v13 = vld [vmem:[%s1370_s1 + $0x100] sm:$0xff] }
   0x4   :  { %776 = vmatprep.subr.bf16.mxu0 %v775_v5  ;;  %v73_v14 = vld [vmem:[%s1370_s1 + $0x108] sm:$0xff]  ;;  %v60_v15 = vld [vmem:[%s1370_s1 + $0xa0] sm:$0xff]  ;;  %v781_v17 = vpack.c.bf16 %v43_v12, %v42_v11  ;;  %v74_v19 = vld [vmem:[%s1370_s1 + $0x110] sm:$0xff] }
   0x5   :  { %v61_v16 = vld [vmem:[%s1370_s1 + $0xa8] sm:$0xff]  ;;  %778 = vmatpush3.bf16.msra.mxu0 %v777_v9  ;;  %v808_v18 = vpack.c.bf16 %v73_v14, %v72_v13  ;;  %v44_v21 = vld [vmem:[%s1370_s1 + $0x20] sm:$0xff]  ;;  %v75_v23 = vld [vmem:[%s1370_s1 + $0x118] sm:$0xff] }
   0x6   :  { %780 = vmatprep.subr.bf16.mxu0 %v779_v10  ;;  %v783_v20 = vpack.c.bf16 %v61_v16, %v60_v15  ;;  %v45_v22 = vld [vmem:[%s1370_s1 + $0x28] sm:$0xff]  ;;  %v811_v24 = vpack.c.bf16 %v75_v23, %v74_v19  ;;  %v62_v25 = vld [vmem:[%s1370_s1 + $0xb0] sm:$0xff]  ;;  %v63_v26 = vld [vmem:[%s1370_s1 + $0xb8] sm:$0xff] }
   0x7   :  { %809 = vmatpush3.bf16.msra.mxu1 %v808_v18  ;;  %v76_v27 = vld [vmem:[%s1370_s1 + $0x120] sm:$0xff]  ;;  %v77_v28 = vld [vmem:[%s1370_s1 + $0x128] sm:$0xff]  ;;  %v785_v29 = vpack.c.bf16 %v45_v22, %v44_v21  ;;  %v787_v30 = vpack.c.bf16 %v63_v26, %v62_v25  ;;  %v46_v31 = vld [vmem:[%s1370_s1 + $0x30] sm:$0xff] }
   0x8   :  { %810 = vmatprep.subr.bf16.mxu1 %v898_v3  ;;  %v47_v32 = vld [vmem:[%s1370_s1 + $0x38] sm:$0xff]  ;;  %v814_v33 = vpack.c.bf16 %v77_v28, %v76_v27  ;;  %v64_v34 = vld [vmem:[%s1370_s1 + $0xc0] sm:$0xff]  ;;  %v65_v35 = vld [vmem:[%s1370_s1 + $0xc8] sm:$0xff] }
   0x9   :  { %782 = vmatpush3.bf16.msra.mxu0 %v781_v17  ;;  %v78_v36 = vld [vmem:[%s1370_s1 + $0x130] sm:$0xff]  ;;  %v79_v37 = vld [vmem:[%s1370_s1 + $0x138] sm:$0xff]  ;;  %v789_v38 = vpack.c.bf16 %v47_v32, %v46_v31  ;;  %v791_v39 = vpack.c.bf16 %v65_v35, %v64_v34  ;;  %v48_v40 = vld [vmem:[%s1370_s1 + $0x40] sm:$0xff] }
   0xa   :  { %784 = vmatprep.subr.bf16.mxu0 %v783_v20  ;;  %v49_v41 = vld [vmem:[%s1370_s1 + $0x48] sm:$0xff]  ;;  %v817_v42 = vpack.c.bf16 %v79_v37, %v78_v36  ;;  %v66_v43 = vld [vmem:[%s1370_s1 + $0xd0] sm:$0xff]  ;;  %v67_v44 = vld [vmem:[%s1370_s1 + $0xd8] sm:$0xff] }
   0xb   :  { %812 = vmatpush3.bf16.msra.mxu1 %v811_v24  ;;  %v80_v45 = vld [vmem:[%s1370_s1 + $0x140] sm:$0xff]  ;;  %v81_v46 = vld [vmem:[%s1370_s1 + $0x148] sm:$0xff]  ;;  %v793_v48 = vpack.c.bf16 %v49_v41, %v48_v40  ;;  %v795_v49 = vpack.c.bf16 %v67_v44, %v66_v43  ;;  %v50_v50 = vld [vmem:[%s1370_s1 + $0x50] sm:$0xff] }
   0xc   :  { %813 = vmatprep.subr.bf16.mxu1 %v898_v3  ;;  %v21_v47 = vld [vmem:[%s1371_s0 + $0x8] sm:$0xff]  ;;  %v51_v51 = vld [vmem:[%s1370_s1 + $0x58] sm:$0xff]  ;;  %v820_v52 = vpack.c.bf16 %v81_v46, %v80_v45  ;;  %v68_v53 = vld [vmem:[%s1370_s1 + $0xe0] sm:$0xff] }
   0xd   :  { %786 = vmatpush3.bf16.msra.mxu0 %v785_v29  ;;  %159 = vmatprep.mubr.f32.mxu0 %v21_v47  ;;  %v69_v54 = vld [vmem:[%s1370_s1 + $0xe8] sm:$0xff]  ;;  %v82_v55 = vld [vmem:[%s1370_s1 + $0x150] sm:$0xff]  ;;  %v83_v56 = vld [vmem:[%s1370_s1 + $0x158] sm:$0xff]  ;;  %v797_v57 = vpack.c.bf16 %v51_v51, %v50_v50 }
   0xe   :  { %788 = vmatprep.subr.bf16.mxu0 %v787_v30  ;;  %v799_v58 = vpack.c.bf16 %v69_v54, %v68_v53  ;;  %v52_v59 = vld [vmem:[%s1370_s1 + $0x60] sm:$0xff]  ;;  %v53_v60 = vld [vmem:[%s1370_s1 + $0x68] sm:$0xff]  ;;  %v823_v61 = vpack.c.bf16 %v83_v56, %v82_v55  ;;  %v70_v62 = vld [vmem:[%s1370_s1 + $0xf0] sm:$0xff] }
   0xf   :  { %815 = vmatpush3.bf16.msra.mxu1 %v814_v33  ;;  %v71_v63 = vld [vmem:[%s1370_s1 + $0xf8] sm:$0xff]  ;;  %v84_v0 = vld [vmem:[%s1370_s1 + $0x160] sm:$0xff]  ;;  %v85_v1 = vld [vmem:[%s1370_s1 + $0x168] sm:$0xff]  ;;  %v801_v2 = vpack.c.bf16 %v53_v60, %v52_v59 }
  0x10   :  { %816 = vmatprep.subr.bf16.mxu1 %v898_v3  ;;  %v803_v5 = vpack.c.bf16 %v71_v63, %v70_v62  ;;  %v54_v6 = vld [vmem:[%s1370_s1 + $0x70] sm:$0xff]  ;;  %v55_v7 = vld [vmem:[%s1370_s1 + $0x78] sm:$0xff]  ;;  %v826_v8 = vpack.c.bf16 %v85_v1, %v84_v0  ;;  %v320_v9 = vld [vmem:[%s1372_s3 + $0x80] sm:$0xff] }
  0x11   :  { %790 = vmatpush3.bf16.msra.mxu0 %v789_v38  ;;  %v321_v10 = vld [vmem:[%s1372_s3 + $0x88] sm:$0xff]  ;;  %v86_v11 = vld [vmem:[%s1370_s1 + $0x170] sm:$0xff]  ;;  %v87_v12 = vld [vmem:[%s1370_s1 + $0x178] sm:$0xff]  ;;  %v805_v13 = vpack.c.bf16 %v55_v7, %v54_v6 }
  0x12   :  { %792 = vmatprep.subr.bf16.mxu0 %v791_v39  ;;  %v352_v14 = vld [vmem:[%s1372_s3 + $0x180] sm:$0xff]  ;;  %v353_v15 = vld [vmem:[%s1372_s3 + $0x188] sm:$0xff]  ;;  %v831_v16 = vpack.c.bf16 %v321_v10, %v320_v9  ;;  %v829_v19 = vpack.c.bf16 %v87_v12, %v86_v11  ;;  %v322_v20 = vld [vmem:[%s1372_s3 + $0x90] sm:$0xff] }
  0x13   :  { %818 = vmatpush3.bf16.msra.mxu1 %v817_v42  ;;  %v304_v17 = vld [vmem:[%s1372_s3] sm:$0xff]  ;;  %v305_v18 = vld [vmem:[%s1372_s3 + $0x8] sm:$0xff]  ;;  %v323_v21 = vld [vmem:[%s1372_s3 + $0x98] sm:$0xff]  ;;  %v863_v22 = vpack.c.bf16 %v353_v15, %v352_v14 }
  0x14   :  { %819 = vmatprep.subr.bf16.mxu1 %v898_v3  ;;  %v336_v23 = vld [vmem:[%s1372_s3 + $0x100] sm:$0xff]  ;;  %v337_v24 = vld [vmem:[%s1372_s3 + $0x108] sm:$0xff]  ;;  %v833_v26 = vpack.c.bf16 %v305_v18, %v304_v17  ;;  %v354_v27 = vld [vmem:[%s1372_s3 + $0x190] sm:$0xff]  ;;  %v835_v29 = vpack.c.bf16 %v323_v21, %v322_v20 }
  0x15   :  { %794 = vmatpush3.bf16.msra.mxu0 %v793_v48  ;;  %v20_v25 = vld [vmem:[%s1371_s0] sm:$0xff]  ;;  %v25_v28 = vld [vmem:[%s1371_s0 + $0x28] sm:$0xff]  ;;  %v306_v30 = vld [vmem:[%s1372_s3 + $0x10] sm:$0xff]  ;;  %v865_v33 = vpack.c.bf16 %v337_v24, %v336_v23 }
  0x16   :  { %796 = vmatprep.subr.bf16.mxu0 %v795_v49  ;;  %v307_v31 = vld [vmem:[%s1372_s3 + $0x18] sm:$0xff]  ;;  %v22_v32 = vld [vmem:[%s1371_s0 + $0x10] sm:$0xff]  ;;  %v324_v34 = vld [vmem:[%s1372_s3 + $0xa0] sm:$0xff] }
  0x17   :  { %821 = vmatpush3.bf16.msra.mxu1 %v820_v52  ;;  %v325_v35 = vld [vmem:[%s1372_s3 + $0xa8] sm:$0xff]  ;;  %v338_v37 = vld [vmem:[%s1372_s3 + $0x110] sm:$0xff]  ;;  %v339_v38 = vld [vmem:[%s1372_s3 + $0x118] sm:$0xff]  ;;  %v837_v40 = vpack.c.bf16 %v307_v31, %v306_v30 }
  0x18   :  { %822 = vmatprep.subr.bf16.mxu1 %v898_v3  ;;  %v24_v39 = vld [vmem:[%s1371_s0 + $0x20] sm:$0xff]  ;;  %v357_v42 = vld [vmem:[%s1372_s3 + $0x1a8] sm:$0xff]  ;;  %v839_v44 = vpack.c.bf16 %v325_v35, %v324_v34  ;;  %v26_v47 = vld [vmem:[%s1371_s0 + $0x30] sm:$0xff]  ;;  %v869_v48 = vpack.c.bf16 %v339_v38, %v338_v37 }
  0x19   :  { %798 = vmatpush3.bf16.msra.mxu0 %v797_v57  ;;  %v356_v41 = vld [vmem:[%s1372_s3 + $0x1a0] sm:$0xff]  ;;  %v29_v43 = vld [vmem:[%s1371_s0 + $0x48] sm:$0xff]  ;;  %v326_v49 = vld [vmem:[%s1372_s3 + $0xb0] sm:$0xff] }
  0x1a   :  { %800 = vmatprep.subr.bf16.mxu0 %v799_v58  ;;  %v308_v45 = vld [vmem:[%s1372_s3 + $0x20] sm:$0xff]  ;;  %v309_v46 = vld [vmem:[%s1372_s3 + $0x28] sm:$0xff]  ;;  %v327_v50 = vld [vmem:[%s1372_s3 + $0xb8] sm:$0xff]  ;;  %v871_v51 = vpack.c.bf16 %v357_v42, %v356_v41 }
  0x1b   :  { %824 = vmatpush3.bf16.msra.mxu1 %v823_v61  ;;  %v340_v52 = vld [vmem:[%s1372_s3 + $0x120] sm:$0xff]  ;;  %v341_v53 = vld [vmem:[%s1372_s3 + $0x128] sm:$0xff]  ;;  %v841_v55 = vpack.c.bf16 %v309_v46, %v308_v45  ;;  %v843_v57 = vpack.c.bf16 %v327_v50, %v326_v49  ;;  %v30_v58 = vld [vmem:[%s1371_s0 + $0x50] sm:$0xff] }
  0x1c   :  { %825 = vmatprep.subr.bf16.mxu1 %v898_v3  ;;  %v28_v54 = vld [vmem:[%s1371_s0 + $0x40] sm:$0xff]  ;;  %v33_v56 = vld [vmem:[%s1371_s0 + $0x68] sm:$0xff]  ;;  %v873_v59 = vpack.c.bf16 %v341_v53, %v340_v52  ;;  %v34_v62 = vld [vmem:[%s1371_s0 + $0x70] sm:$0xff] }
  0x1d   :  { %802 = vmatpush3.bf16.msra.mxu0 %v801_v2  ;;  %v32_v60 = vld [vmem:[%s1371_s0 + $0x60] sm:$0xff]  ;;  %v37_v61 = vld [vmem:[%s1371_s0 + $0x88] sm:$0xff]  ;;  %v38_v0 = vld [vmem:[%s1371_s0 + $0x90] sm:$0xff] }
  0x1e   :  { %804 = vmatprep.subr.bf16.mxu0 %v803_v5  ;;  %v36_v63 = vld [vmem:[%s1371_s0 + $0x80] sm:$0xff]  ;;  %v310_v1 = vld [vmem:[%s1372_s3 + $0x30] sm:$0xff]  ;;  %v311_v2 = vld [vmem:[%s1372_s3 + $0x38] sm:$0xff] }
  0x1f   :  { %827 = vmatpush3.bf16.msra.mxu1 %v826_v8  ;;  %v845_v5 = vpack.c.bf16 %v311_v2, %v310_v1  ;;  %v358_v6 = vld [vmem:[%s1372_s3 + $0x1b0] sm:$0xff]  ;;  %v359_v7 = vld [vmem:[%s1372_s3 + $0x1b8] sm:$0xff]  ;;  %v328_v8 = vld [vmem:[%s1372_s3 + $0xc0] sm:$0xff] }
  0x20   :  { %828 = vmatprep.subr.bf16.mxu1 %v898_v3  ;;  %v355_v3 = vld [vmem:[%s1372_s3 + $0x198] sm:$0xff]  ;;  %v875_v9 = vpack.c.bf16 %v359_v7, %v358_v6  ;;  %v329_v10 = vld [vmem:[%s1372_s3 + $0xc8] sm:$0xff]  ;;  %v342_v11 = vld [vmem:[%s1372_s3 + $0x130] sm:$0xff] }
  0x21   :  { %806 = vmatpush3.bf16.msra.mxu0 %v805_v13  ;;  %v867_v36 = vpack.c.bf16 %v355_v3, %v354_v27  ;;  %v343_v12 = vld [vmem:[%s1372_s3 + $0x138] sm:$0xff]  ;;  %v847_v13 = vpack.c.bf16 %v329_v10, %v328_v8  ;;  %v312_v15 = vld [vmem:[%s1372_s3 + $0x40] sm:$0xff]  ;;  %v330_v21 = vld [vmem:[%s1372_s3 + $0xd0] sm:$0xff] }
  0x22   :  { %832 = vmatprep.subr.bf16.mxu0 %v831_v16  ;;  %v877_v14 = vpack.c.bf16 %v343_v12, %v342_v11  ;;  %v313_v16 = vld [vmem:[%s1372_s3 + $0x48] sm:$0xff]  ;;  %v360_v18 = vld [vmem:[%s1372_s3 + $0x1c0] sm:$0xff]  ;;  %v315_v27 = vld [vmem:[%s1372_s3 + $0x58] sm:$0xff] }
  0x23   :  { %830 = vmatpush3.bf16.msra.mxu1 %v829_v19  ;;  %v849_v17 = vpack.c.bf16 %v313_v16, %v312_v15  ;;  %v361_v19 = vld [vmem:[%s1372_s3 + $0x1c8] sm:$0xff]  ;;  %v344_v23 = vld [vmem:[%s1372_s3 + $0x140] sm:$0xff]  ;;  %v363_v30 = vld [vmem:[%s1372_s3 + $0x1d8] sm:$0xff] }
  0x24   :  { %160 = vmatmul.mubr.f32.vlgmr.msra.gmra.mrb[0].mxu0 %v20_v25  ;;  %864 = vmatprep.subr.bf16.mxu1 %v863_v22  ;;  %v879_v20 = vpack.c.bf16 %v361_v19, %v360_v18  ;;  %v331_v22 = vld [vmem:[%s1372_s3 + $0xd8] sm:$0xff]  ;;  %v345_v25 = vld [vmem:[%s1372_s3 + $0x148] sm:$0xff]  ;;  %v332_v31 = vld [vmem:[%s1372_s3 + $0xe0] sm:$0xff] }
  0x25   :  { %164 = vmatprep.mubr.f32.mxu0 %v25_v28  ;;  %834 = vmatpush3.bf16.msra.mxu0 %v833_v26  ;;  %v851_v24 = vpack.c.bf16 %v331_v22, %v330_v21  ;;  %v314_v26 = vld [vmem:[%s1372_s3 + $0x50] sm:$0xff]  ;;  %v881_v3 = vpack.c.bf16 %v345_v25, %v344_v23  ;;  %v347_v35 = vld [vmem:[%s1372_s3 + $0x158] sm:$0xff]  ;;  %v316_v38 = vld [vmem:[%s1372_s3 + $0x60] sm:$0xff] }
  0x26   :  { %761 = vmatmul.mubr.f32.vlgmr.msra.gmra.mrb[0].mxu1 %v22_v32  ;;  %836 = vmatprep.subr.bf16.mxu0 %v835_v29  ;;  %v853_v28 = vpack.c.bf16 %v315_v27, %v314_v26  ;;  %v362_v29 = vld [vmem:[%s1372_s3 + $0x1d0] sm:$0xff]  ;;  %v364_v41 = vld [vmem:[%s1372_s3 + $0x1e0] sm:$0xff]  ;;  %v365_v42 = vld [vmem:[%s1372_s3 + $0x1e8] sm:$0xff] }
  0x27   :  { %763 = vmatprep.mubr.msk.f32.mxu1 %vm899_vm0, %v900_v4  ;;  %866 = vmatpush3.bf16.msra.mxu1 %v865_v33  ;;  %v883_v32 = vpack.c.bf16 %v363_v30, %v362_v29  ;;  %v333_v33 = vld [vmem:[%s1372_s3 + $0xe8] sm:$0xff]  ;;  %v346_v34 = vld [vmem:[%s1372_s3 + $0x150] sm:$0xff]  ;;  %v335_v45 = vld [vmem:[%s1372_s3 + $0xf8] sm:$0xff] }
  0x28   :  { %165 = vmatmul.mubr.f32.gmra.mrb[2].mxu0 %v24_v39  ;;  %868 = vmatprep.subr.bf16.mxu1 %v867_v36  ;;  %v855_v36 = vpack.c.bf16 %v333_v33, %v332_v31  ;;  %v885_v37 = vpack.c.bf16 %v347_v35, %v346_v34  ;;  %v317_v39 = vld [vmem:[%s1372_s3 + $0x68] sm:$0xff]  ;;  %v348_v46 = vld [vmem:[%s1372_s3 + $0x160] sm:$0xff]  ;;  %v318_v50 = vld [vmem:[%s1372_s3 + $0x70] sm:$0xff] }
  0x29   :  { %169 = vmatprep.mubr.f32.mxu0 %v29_v43  ;;  %838 = vmatpush3.bf16.msra.mxu0 %v837_v40  ;;  %v857_v40 = vpack.c.bf16 %v317_v39, %v316_v38  ;;  %v334_v43 = vld [vmem:[%s1372_s3 + $0xf0] sm:$0xff] }
  0x2a   :  { %764 = vmatmul.mubr.f32.gmra.mrb[2].mxu1 %v26_v47  ;;  %840 = vmatprep.subr.bf16.mxu0 %v839_v44  ;;  %v887_v44 = vpack.c.bf16 %v365_v42, %v364_v41  ;;  %v349_v47 = vld [vmem:[%s1372_s3 + $0x168] sm:$0xff]  ;;  %v366_v53 = vld [vmem:[%s1372_s3 + $0x1f0] sm:$0xff]  ;;  %v31_v42 = vld [vmem:[%s1371_s0 + $0x58] sm:$0xff] }
  0x2b   :  { %766 = vmatprep.mubr.msk.f32.mxu1 %vm899_vm0, %v900_v4  ;;  %870 = vmatpush3.bf16.msra.mxu1 %v869_v48  ;;  %v859_v48 = vpack.c.bf16 %v335_v45, %v334_v43  ;;  %v889_v49 = vpack.c.bf16 %v349_v47, %v348_v46  ;;  %v35_v47 = vld [vmem:[%s1371_s0 + $0x78] sm:$0xff] }
  0x2c   :  { %170 = vmatmul.mubr.f32.gmra.mrb[4].mxu0 %v28_v54  ;;  %872 = vmatprep.subr.bf16.mxu1 %v871_v51  ;;  %v319_v51 = vld [vmem:[%s1372_s3 + $0x78] sm:$0xff] }
  0x2d   :  { %174 = vmatprep.mubr.f32.mxu0 %v33_v56  ;;  %842 = vmatpush3.bf16.msra.mxu0 %v841_v55  ;;  %v861_v52 = vpack.c.bf16 %v319_v51, %v318_v50  ;;  %v367_v54 = vld [vmem:[%s1372_s3 + $0x1f8] sm:$0xff]  ;;  %v350_v56 = vld [vmem:[%s1372_s3 + $0x170] sm:$0xff] }
  0x2e   :  { %767 = vmatmul.mubr.f32.gmra.mrb[4].mxu1 %v30_v58  ;;  %844 = vmatprep.subr.bf16.mxu0 %v843_v57  ;;  %v891_v55 = vpack.c.bf16 %v367_v54, %v366_v53  ;;  %v351_v57 = vld [vmem:[%s1372_s3 + $0x178] sm:$0xff] }
  0x2f   :  { %769 = vmatprep.mubr.msk.f32.mxu1 %vm899_vm0, %v900_v4  ;;  %874 = vmatpush3.bf16.msra.mxu1 %v873_v59  ;;  %v893_v58 = vpack.c.bf16 %v351_v57, %v350_v56  ;;  %v23_v59 = vld [vmem:[%s1371_s0 + $0x18] sm:$0xff]  ;;  %v565_v56 = vld [vmem:[%s1374_s4] ss:$0 sm:$0xff] }
  0x30   :  { %175 = vmatmul.mubr.f32.gmra.mrb[6].mxu0 %v32_v60  ;;  %876 = vmatprep.subr.bf16.mxu1 %v875_v9  ;;  %v39_v50 = vld [vmem:[%s1371_s0 + $0x98] sm:$0xff] }
  0x31   :  { %179 = vmatprep.mubr.f32.mxu0 %v37_v61  ;;  %846 = vmatpush3.bf16.msra.mxu0 %v845_v5 }
  0x32   :  { %770 = vmatmul.mubr.f32.gmra.mrb[6].mxu1 %v34_v62  ;;  %848 = vmatprep.subr.bf16.mxu0 %v847_v13  ;;  %v564_v62 = vld [vmem:[%s1373_s2] ss:$0 sm:$0xff] }
  0x33   :  { %772 = vmatprep.mubr.msk.f32.mxu1 %vm899_vm0, %v900_v4  ;;  %878 = vmatpush3.bf16.msra.mxu1 %v877_v14 }
  0x34   :  { %180 = vmatmul.mubr.f32.gmra.mrb[8].mxu0 %v36_v63  ;;  %880 = vmatprep.subr.bf16.mxu1 %v879_v20 }
  0x35   :  { %850 = vmatpush3.bf16.msra.mxu0 %v849_v17 }
  0x36   :  { %773 = vmatmul.mubr.f32.gmra.mrb[8].mxu1 %v38_v0  ;;  %852 = vmatprep.subr.bf16.mxu0 %v851_v24 }
  0x37   :  { %882 = vmatpush3.bf16.msra.mxu1 %v881_v3  ;;  %529 = vmatprep.mubr.f32.mxu1 %v23_v59 }
  0x38   :  { %884 = vmatprep.subr.bf16.mxu1 %v883_v32 }
  0x39   :  { %854 = vmatpush3.bf16.msra.mxu0 %v853_v28 }
  0x3a   :  { %856 = vmatprep.subr.bf16.mxu0 %v855_v36 }
  0x3b   :  { %886 = vmatpush3.bf16.msra.mxu1 %v885_v37  ;;  %v27_v37 = vld [vmem:[%s1371_s0 + $0x38] sm:$0xff] }
  0x3c   :  { %888 = vmatprep.subr.bf16.mxu1 %v887_v44 }
  0x3d   :  { %858 = vmatpush3.bf16.msra.mxu0 %v857_v40 }
  0x3e   :  { %860 = vmatprep.subr.bf16.mxu0 %v859_v48 }
  0x3f   :  { %890 = vmatpush3.bf16.msra.mxu1 %v889_v49 }
  0x40   :  { %892 = vmatprep.subr.bf16.mxu1 %v891_v55 }
  0x41   :  { %862 = vmatpush3.bf16.msra.mxu0 %v861_v52 }
  0x43   :  { %894 = vmatpush3.bf16.msra.mxu1 %v893_v58 }
  0xf7   :  { %v598_v60 = vpop.f32.mrb[0].mxu0 }
  0xf8   :  { %v599_v61 = vpop.f32.mrb[1].mxu0 }
  0xf9   :  { %v600_v63 = vadd.f32 %v599_v61, %v598_v60  ;;  %v251_v0 = vpop.f32.mrb[0].mxu1 }
  0xfa   :  { %v762_v1 = vpop.f32.mrb[1].mxu1 }
  0xfb   :  { %v601_v2 = vpop.f32.mrb[2].mxu0  ;;  %v162_v5 = vadd.f32 %v600_v63, %v564_v62 }
  0xfc   :  { %v602_v6 = vpop.f32.mrb[3].mxu0 }
  0xfd   :  { %v252_v7 = vadd.f32 %v251_v0, %v162_v5  ;;  %v603_v8 = vadd.f32 %v602_v6, %v601_v2  ;;  %v256_v9 = vpop.f32.mrb[2].mxu1 }
  0xfe   :  { %v765_v10 = vpop.f32.mrb[3].mxu1 }
  0xff   :  { %v275_v11 = vmax.f32 %v252_v7, 0.0  ;;  %v604_v12 = vpop.f32.mrb[4].mxu0  ;;  %v167_v13 = vadd.f32 %v603_v8, %v564_v62 }
 0x100   :  { %v605_v14 = vpop.f32.mrb[5].mxu0 }
 0x101   :  { %280 = vst [vmem:[#allocation2 + $0x8] sm:$0xff] %v275_v11  ;;  %v257_v15 = vadd.f32 %v256_v9, %v167_v13  ;;  %v606_v16 = vadd.f32 %v605_v14, %v604_v12  ;;  %v261_v17 = vpop.f32.mrb[4].mxu1  ;;  %439 = vmatprep.mubr.f32.mxu0 %v275_v11 }
 0x102   :  { %v768_v18 = vpop.f32.mrb[5].mxu1 }
 0x103   :  { %v276_v19 = vmax.f32 %v257_v15, 0.0  ;;  %v607_v20 = vpop.f32.mrb[6].mxu0  ;;  %v172_v21 = vadd.f32 %v606_v16, %v564_v62 }
 0x104   :  { %v608_v22 = vpop.f32.mrb[7].mxu0 }
 0x105   :  { %281 = vst [vmem:[#allocation2 + $0x10] sm:$0xff] %v276_v19  ;;  %v262_v23 = vadd.f32 %v261_v17, %v172_v21  ;;  %v609_v24 = vadd.f32 %v608_v22, %v607_v20  ;;  %v266_v25 = vpop.f32.mrb[6].mxu1 }
 0x106   :  { %v771_v26 = vpop.f32.mrb[7].mxu1 }
 0x107   :  { %v277_v27 = vmax.f32 %v262_v23, 0.0  ;;  %v610_v3 = vpop.f32.mrb[8].mxu0  ;;  %v177_v28 = vadd.f32 %v609_v24, %v564_v62 }
 0x108   :  { %v611_v29 = vpop.f32.mrb[9].mxu0  ;;  %v289_v30 = vld [vmem:[#allocation2 + $0x7] sm:$0xff] }
 0x109   :  { %282 = vst [vmem:[#allocation2 + $0x18] sm:$0xff] %v277_v27  ;;  %v612_v31 = vadd.f32 %v611_v29, %v610_v3  ;;  %v267_v32 = vadd.f32 %v266_v25, %v177_v28  ;;  %440 = vmatmul.mubr.f32.vlgmr.msra.gmra.mrb[10].mxu0 %v289_v30  ;;  %v271_v33 = vpop.f32.mrb[8].mxu1 }
 0x10a   :  { %286 = vst [vmem:[#allocation2 + $0x18] sm:$0x1] %v900_v4  ;;  %287 = vst [vmem:[#allocation2 + $0x19] sm:$0x1] %v900_v4  ;;  %v774_v34 = vpop.f32.mrb[9].mxu1  ;;  %444 = vmatprep.mubr.f32.mxu0 %v276_v19 }
 0x10b   :  { %v278_v35 = vmax.f32 %v267_v32, 0.0  ;;  %v182_v36 = vadd.f32 %v612_v31, %v564_v62 }
 0x10c   :  { %v299_v38 = vld [vmem:[#allocation2 + $0x9] sm:$0xff] }
 0x10d   :  { %v290_v39 = vld [vmem:[#allocation2 + $0xf] sm:$0xff]  ;;  %283 = vst [vmem:[#allocation2 + $0x20] sm:$0xff] %v278_v35  ;;  %v272_v40 = vadd.f32 %v271_v33, %v182_v36  ;;  %530 = vmatmul.mubr.f32.vlgmr.msra.gmra.mrb[10].mxu1 %v299_v38 }
 0x10e   :  { %445 = vmatmul.mubr.f32.gmra.mrb[12].mxu0 %v290_v39  ;;  %534 = vmatprep.mubr.f32.mxu1 %v27_v37 }
 0x10f   :  { %v279_v41 = vmax.f32 %v272_v40, 0.0 }
 0x111   :  { %284 = vst [vmem:[#allocation2 + $0x28] sm:$0xff] %v279_v41  ;;  %v296_v43 = vld [vmem:[#allocation2 + $0x18] sm:$0xff] }
 0x112   :  { %v300_v44 = vld [vmem:[#allocation2 + $0x11] sm:$0xff]  ;;  %288 = vst [vmem:[#allocation2 + $0x2a] sm:$0x1] %v900_v4  ;;  %449 = vmatprep.mubr.f32.mxu0 %v296_v43 }
 0x113   :  { %v291_v45 = vld [vmem:[#allocation2 + $0x17] sm:$0xff]  ;;  %535 = vmatmul.mubr.f32.gmra.mrb[12].mxu1 %v300_v44 }
 0x114   :  { %450 = vmatmul.mubr.f32.gmra.mrb[14].mxu0 %v291_v45  ;;  %539 = vmatprep.mubr.f32.mxu1 %v31_v42  ;;  %v301_v46 = vld [vmem:[#allocation2 + $0x19] sm:$0xff] }
 0x115   :  { %454 = vmatprep.mubr.f32.mxu0 %v278_v35  ;;  %v292_v48 = vld [vmem:[#allocation2 + $0x1f] sm:$0xff] }
 0x117   :  { %540 = vmatmul.mubr.f32.gmra.mrb[14].mxu1 %v301_v46 }
 0x118   :  { %455 = vmatmul.mubr.f32.gmra.mrb[16].mxu0 %v292_v48  ;;  %544 = vmatprep.mubr.f32.mxu1 %v35_v47  ;;  %v302_v49 = vld [vmem:[#allocation2 + $0x21] sm:$0xff] }
 0x119   :  { %v298_v4 = vld [vmem:[#allocation2 + $0x28] sm:$0xff] }
 0x11a   :  { %v293_v51 = vld [vmem:[#allocation2 + $0x27] sm:$0xff]  ;;  %459 = vmatprep.mubr.f32.mxu0 %v298_v4 }
 0x11b   :  { %545 = vmatmul.mubr.f32.gmra.mrb[16].mxu1 %v302_v49  ;;  %v303_v52 = vld [vmem:[#allocation2 + $0x29] sm:$0xff] }
 0x11c   :  { %460 = vmatmul.mubr.f32.gmra.mrb[18].mxu0 %v293_v51  ;;  %549 = vmatprep.mubr.f32.mxu1 %v39_v50 }
 0x11f   :  { %550 = vmatmul.mubr.f32.gmra.mrb[18].mxu1 %v303_v52 }
 0x1dc   :  { %v666_v53 = vpop.f32.mrb[10].mxu0 }
 0x1dd   :  { %v667_v54 = vpop.f32.mrb[11].mxu0 }
 0x1de   :  { %v668_v55 = vadd.f32 %v667_v54, %v666_v53 }
 0x1e0   :  { %v713_v57 = vpop.f32.mrb[10].mxu1  ;;  %v442_v61 = vadd.f32 %v668_v55, %v565_v56 }
 0x1e1   :  { %v669_v58 = vpop.f32.mrb[12].mxu0  ;;  %v714_v59 = vpop.f32.mrb[11].mxu1 }
 0x1e2   :  { %v670_v60 = vpop.f32.mrb[13].mxu0  ;;  %v715_v62 = vadd.f32 %v714_v59, %v713_v57 }
 0x1e3   :  { %v671_v63 = vadd.f32 %v670_v60, %v669_v58 }
 0x1e4   :  { %v532_v0 = vadd.f32 %v715_v62, %v442_v61 }
 0x1e5   :  { %v447_v6 = vadd.f32 %v671_v63, %v565_v56 }
 0x1e6   :  { %v716_v1 = vpop.f32.mrb[12].mxu1  ;;  %555 = vst [vmem:[%s1375_s5] sm:$0xff] %v532_v0 }
 0x1e7   :  { %v672_v2 = vpop.f32.mrb[14].mxu0  ;;  %v717_v5 = vpop.f32.mrb[13].mxu1 }
 0x1e8   :  { %v718_v7 = vadd.f32 %v717_v5, %v716_v1  ;;  %v673_v8 = vpop.f32.mrb[15].mxu0 }
 0x1e9   :  { %v674_v9 = vadd.f32 %v673_v8, %v672_v2 }
 0x1ea   :  { %v537_v10 = vadd.f32 %v718_v7, %v447_v6  ;;  %v719_v11 = vpop.f32.mrb[14].mxu1 }
 0x1eb   :  { %v452_v12 = vadd.f32 %v674_v9, %v565_v56  ;;  %v675_v13 = vpop.f32.mrb[16].mxu0  ;;  %v720_v14 = vpop.f32.mrb[15].mxu1 }
 0x1ec   :  { %556 = vst [vmem:[%s1375_s5 + $0x8] sm:$0xff] %v537_v10  ;;  %v721_v15 = vadd.f32 %v720_v14, %v719_v11  ;;  %v676_v16 = vpop.f32.mrb[17].mxu0 }
 0x1ed   :  { %v677_v17 = vadd.f32 %v676_v16, %v675_v13 }
 0x1ee   :  { %v542_v18 = vadd.f32 %v721_v15, %v452_v12  ;;  %v722_v19 = vpop.f32.mrb[16].mxu1 }
 0x1ef   :  { %v457_v20 = vadd.f32 %v677_v17, %v565_v56  ;;  %v678_v21 = vpop.f32.mrb[18].mxu0  ;;  %v723_v22 = vpop.f32.mrb[17].mxu1 }
 0x1f0   :  { %557 = vst [vmem:[%s1375_s5 + $0x10] sm:$0xff] %v542_v18  ;;  %v724_v23 = vadd.f32 %v723_v22, %v722_v19  ;;  %v679_v24 = vpop.f32.mrb[19].mxu0 }
 0x1f1   :  { %v680_v25 = vadd.f32 %v679_v24, %v678_v21 }
 0x1f2   :  { %v547_v26 = vadd.f32 %v724_v23, %v457_v20  ;;  %v725_v27 = vpop.f32.mrb[18].mxu1 }
 0x1f3   :  { %v462_v3 = vadd.f32 %v680_v25, %v565_v56  ;;  %v726_v28 = vpop.f32.mrb[19].mxu1 }
 0x1f4   :  { %558 = vst [vmem:[%s1375_s5 + $0x18] sm:$0xff] %v547_v26  ;;  %v727_v29 = vadd.f32 %v726_v28, %v725_v27 }
 0x1f6   :  { %v552_v30 = vadd.f32 %v727_v29, %v462_v3 }
 0x1f8   :  { %559 = vst [vmem:[%s1375_s5 + $0x20] sm:$0xff] %v552_v30 }

</bundles_post_ra>
